<compile_context>
chip_gen: v6e
topology: v6e:2x2x1
jax: 0.10.0
libtpu: 0.0.40
codegen_flags: <defaults>
</compile_context>

<pallas_src>
import jax
import jax.numpy as jnp
from jax.experimental import pallas as pl
from jax.experimental.pallas import tpu as pltpu


# ----------------------------------------------------------------------------
# Fused adaptive-avg-pool(1x1) + flatten + Linear Pallas kernel
# ----------------------------------------------------------------------------
def _pool_fc_kernel(x_ref, w_ref, b_ref, o_ref):
    # x_ref: (bn, HW, C)  channels-last activations (lane dim = C -> lane-dense)
    # w_ref: (C, OP)      fc weight^T, pre-scaled by 1/HW, zero-padded, bf16
    # b_ref: (1, OP)      fc bias, zero-padded, f32
    # o_ref: (1, bn, OP)  padded logits block, f32
    # Global average pool: reduce over the second-minor (spatial) axis — mostly
    # VPU adds across vregs.  The 1/HW scale is folded into w_ref.
    pooled = jnp.sum(x_ref[...].astype(jnp.float32), axis=1)          # (bn, C)
    y = jnp.dot(pooled.astype(w_ref.dtype), w_ref[...],
                preferred_element_type=jnp.float32)                   # MXU, f32 acc
    o_ref[0] = (y + b_ref[...]).astype(o_ref.dtype)


def _round_up(x, m):
    return pl.cdiv(x, m) * m


def _vmem_capacity_bytes():
    """Physical per-core VMEM; conservative 64 MiB (v7x) if the query fails."""
    try:
        cap = getattr(pltpu.get_tpu_info(), "vmem_capacity_bytes", None)
        if cap:
            return int(cap)
    except Exception:
        pass
    return 64 << 20


def _pick_batch_block(n, per_image_bytes, avail_bytes, min_steps):
    """Largest divisor of n that fits the VMEM budget and yields >= min_steps."""
    bn_cap = max(int(avail_bytes // max(per_image_bytes, 1)), 1)
    bn_cap = min(bn_cap, max(1, -(-n // min_steps)))     # ceil(n / min_steps)
    for d in range(bn_cap, 0, -1):
        if n % d == 0:
            return d
    return 1


def fused_avgpool_fc(x_nlc, fc_w, fc_b):
    """y = Linear(mean_over_spatial(x)) in one Pallas kernel.

    x_nlc: (N, HW, C) channels-last activations (lane-dense when C % 128 == 0)
    fc_w:  (O, C) float  (PyTorch Linear layout)
    fc_b:  (O,)   float
    returns (N, O) float32
    """
    N, HW, C = x_nlc.shape
    O = fc_w.shape[0]
    OP = _round_up(max(O, 1), 128)        # lane-dense padded output width (>= 128)

    # Fold the 1/HW pooling scale into the transposed, lane-padded weight and
    # stream it as bf16 (MXU takes bf16 on all generations; accumulate in f32).
    w_scaled = (fc_w.T.astype(jnp.float32) / float(HW)).astype(jnp.bfloat16)
    w_pad = jnp.zeros((C, OP), jnp.bfloat16).at[:, :O].set(w_scaled)
    b_pad = jnp.zeros((1, OP), jnp.float32).at[:, :O].set(fc_b.astype(jnp.float32))

    # ---- generation-aware VMEM budget / batch tiling ------------------------
    vmem_cap = _vmem_capacity_bytes()
    vmem_limit = min(3 * vmem_cap // 4, 96 << 20)   # 48 MiB on v7x, 96 MiB on v5e/v6e
    # Resident cost: weight + bias, 2x each (default double-buffering; the saving
    # from pl.Buffered(1) on these invariants is <1 MiB, so it is simply budgeted).
    fixed = 2 * (C * OP * 2) + 2 * (OP * 4)
    headroom = 2 << 20
    avail = max(vmem_limit - fixed - headroom, 1 << 20)
    in_img = _round_up(HW, 8) * _round_up(C, 128) * x_nlc.dtype.itemsize
    out_img = OP * 4
    per_image = 2 * (in_img + out_img)              # 2x: Pallas double-buffers blocks
    min_steps = 2 if N >= 2 else 1                  # >=2 grid steps keeps both v7x TCs busy
    bn = _pick_batch_block(N, per_image, avail, min_steps)
    # TODO(synk): if a single image's (HW, C) block exceeds the VMEM budget,
    # also tile the spatial axis and accumulate the pooled sum across grid steps.
    G = N // bn                                     # grid steps (bn divides N)

    out = pl.pallas_call(
        _pool_fc_kernel,
        out_shape=jax.ShapeDtypeStruct((G, bn, OP), jnp.float32),
        grid_spec=pltpu.PrefetchScalarGridSpec(
            num_scalar_prefetch=0,
            grid=(G,),
            in_specs=[
                pl.BlockSpec((bn, HW, C), lambda i: (i, 0, 0)),
                pl.BlockSpec((C, OP), lambda i: (0, 0)),   # VMEM-resident across steps
                pl.BlockSpec((1, OP), lambda i: (0, 0)),
            ],
            out_specs=pl.BlockSpec((1, bn, OP), lambda i: (i, 0, 0)),
        ),
        compiler_params=pltpu.CompilerParams(
            dimension_semantics=("parallel",),   # batch tiles shard over TCs on v7x
            vmem_limit_bytes=int(vmem_limit),
        ),
    )(x_nlc, w_pad, b_pad)
    return out.reshape(N, OP)[:, :O]


# ----------------------------------------------------------------------------
# Module wrapper (matching the PyTorch module's __init__ / forward)
#   Linear: weight ~ Normal(std=0.001), bias = 0
# ----------------------------------------------------------------------------
def init_resnet0_blocks(key, inplanes=2048, num_classes=2):
    kw, _ = jax.random.split(key)
    return {
        "fc_w": 0.001 * jax.random.normal(kw, (num_classes, inplanes), jnp.float32),
        "fc_b": jnp.zeros((num_classes,), jnp.float32),
    }


def resnet0_blocks_fwd(x, params, *, channels_last=False):
    """forward: avgpool(1x1) -> flatten -> fc, fused into a single Pallas kernel.

    x: (N, C, H, W) if channels_last=False (PyTorch layout), else (N, H, W, C).
    """
    if not channels_last:
        # TODO(synk): plumb channels-last (and/or bf16) activations straight from
        # the producing layer; this transpose is an extra HBM pass that the fused
        # kernel itself does not need.
        x = jnp.transpose(x, (0, 2, 3, 1))
    N, H, W, C = x.shape
    x_nlc = x.reshape(N, H * W, C)
    return fused_avgpool_fc(x_nlc, params["fc_w"], params["fc_b"])


# ----------------------------------------------------------------------------
if __name__ == "__main__":
    key = jax.random.PRNGKey(0)
    kparam, kx = jax.random.split(key)

    # Small shapes consistent with the module (Linear(inplanes, 2) head);
    # channels a multiple of 128 so the activation DMA is lane-dense.
    N, C, H, W = 4, 256, 8, 8
    params = init_resnet0_blocks(kparam, inplanes=C, num_classes=2)
    x = jax.random.normal(kx, (N, C, H, W), jnp.float32)   # PyTorch NCHW layout

    out = jax.block_until_ready(resnet0_blocks_fwd(x, params))
    assert out.shape == (N, 2), out.shape
    assert bool(jnp.all(jnp.isfinite(out)))

    # Pure-JAX reference: avgpool -> flatten -> fc.
    ref = jnp.mean(x, axis=(2, 3)) @ params["fc_w"].T + params["fc_b"]
    assert jnp.allclose(out, ref, rtol=5e-2, atol=1e-3), (out, ref)

    # Preferred channels-last path (no relayout pass ahead of the kernel).
    x_nhwc = jnp.transpose(x, (0, 2, 3, 1))
    out_cl = jax.block_until_ready(
        resnet0_blocks_fwd(x_nhwc, params, channels_last=True))
    assert jnp.allclose(out_cl, ref, rtol=5e-2, atol=1e-3), (out_cl, ref)

    print("KERNEL_OK")
</pallas_src>

<mosaic_0001>
module attributes {stable_mosaic.version = 11 : i64} {
  func.func @_pool_fc_kernel(%arg0: i32, %arg1: memref<2x64x256xf32, #tpu.memory_space<vmem>>, %arg2: memref<256x128xbf16, #tpu.memory_space<vmem>>, %arg3: memref<1x128xf32, #tpu.memory_space<vmem>>, %arg4: memref<1x2x128xf32, #tpu.memory_space<vmem>>) attributes {dimension_semantics = [#tpu.dimension_semantics<parallel>], iteration_bounds = array<i64: 2>, scalar_prefetch = 0 : i64, scratch_operands = 0 : i64, tpu.core_type = #tpu.core_type<tc>, window_params = [{transform_indices = @transform_0, window_bounds = array<i64: 2, 64, 256>}, {pipeline_mode = #tpu.pipeline_mode<synchronous>, transform_indices = @transform_1, window_bounds = array<i64: 256, 128>}, {pipeline_mode = #tpu.pipeline_mode<synchronous>, transform_indices = @transform_2, window_bounds = array<i64: 1, 128>}, {transform_indices = @transform_3, window_bounds = array<i64: 1, 2, 128>}]} {
    %c0 = arith.constant 0 : index
    %c0_0 = arith.constant 0 : index
    %c0_1 = arith.constant 0 : index
    %0 = vector.load %arg1[%c0, %c0_0, %c0_1] : memref<2x64x256xf32, #tpu.memory_space<vmem>>, vector<2x64x256xf32>
    %cst = arith.constant dense<0.000000e+00> : vector<2x256xf32>
    %1 = vector.multi_reduction <add>, %0, %cst [1] : vector<2x64x256xf32> to vector<2x256xf32>
    %2 = arith.truncf %1 : vector<2x256xf32> to vector<2x256xbf16>
    %c0_2 = arith.constant 0 : index
    %c0_3 = arith.constant 0 : index
    %3 = vector.load %arg2[%c0_2, %c0_3] : memref<256x128xbf16, #tpu.memory_space<vmem>>, vector<256x128xbf16>
    %cst_4 = arith.constant dense<0.000000e+00> : vector<2x128xf32>
    %4 = tpu.matmul %2, %3, %cst_4 {dimension_numbers = #tpu.dot_dimension_numbers<[1], [0], [0], [1], [0, 0, 1, 1], [], []>} : vector<2x256xbf16>, vector<256x128xbf16>, vector<2x128xf32> -> vector<2x128xf32>
    %c0_5 = arith.constant 0 : index
    %c0_6 = arith.constant 0 : index
    %5 = vector.load %arg3[%c0_5, %c0_6] : memref<1x128xf32, #tpu.memory_space<vmem>>, vector<1x128xf32>
    %6 = vector.broadcast %5 : vector<1x128xf32> to vector<2x128xf32>
    %7 = arith.addf %4, %6 : vector<2x128xf32>
    %c0_7 = arith.constant 0 : index
    %c0_8 = arith.constant 0 : index
    %c0_9 = arith.constant 0 : index
    %8 = vector.load %arg4[%c0_7, %c0_8, %c0_9] : memref<1x2x128xf32, #tpu.memory_space<vmem>>, vector<1x2x128xf32>
    %9 = vector.shape_cast %8 : vector<1x2x128xf32> to vector<2x128xf32>
    %10 = vector.shape_cast %7 : vector<2x128xf32> to vector<1x2x128xf32>
    tpu.vector_store %arg4[%c0_7, %c0_8, %c0_9], %10 {strides = array<i32>} : memref<1x2x128xf32, #tpu.memory_space<vmem>>, vector<1x2x128xf32>,
    return
  }
  func.func @transform_0(%arg0: i32) -> (i32, i32, i32) {
    %c0_i32 = arith.constant 0 : i32
    %c0_i32_0 = arith.constant 0 : i32
    %c0_i32_1 = arith.constant 0 : i32
    return %arg0, %c0_i32, %c0_i32_0 : i32, i32, i32
  }
  func.func @transform_1(%arg0: i32) -> (i32, i32) {
    %c0_i32 = arith.constant 0 : i32
    %c0_i32_0 = arith.constant 0 : i32
    %c0_i32_1 = arith.constant 0 : i32
    return %c0_i32, %c0_i32_0 : i32, i32
  }
  func.func @transform_2(%arg0: i32) -> (i32, i32) {
    %c0_i32 = arith.constant 0 : i32
    %c0_i32_0 = arith.constant 0 : i32
    %c0_i32_1 = arith.constant 0 : i32
    return %c0_i32, %c0_i32_0 : i32, i32
  }
  func.func @transform_3(%arg0: i32) -> (i32, i32, i32) {
    %c0_i32 = arith.constant 0 : i32
    %c0_i32_0 = arith.constant 0 : i32
    %c0_i32_1 = arith.constant 0 : i32
    return %arg0, %c0_i32, %c0_i32_0 : i32, i32, i32
  }
}

</mosaic_0001>

<bundles_post_ra>
// kernel: tpu_custom_call.1
= control target key start
LH: loop header
LB: loop body
LE: loop exit
PB: predicated region body
PF: predicated region fallthrough
CT: control target
= control target key end

     0   :  { %8 = vsyncpa [#allocation3], 0  ;;  %s1072_s0 = inlined_call_operand.hbm [shape: f32[4,64,256], index: 0, kind: input, shape index: {}]   ;;  %s1073_s1 = inlined_call_operand.hbm [shape: bf16[256,128], index: 1, kind: input, shape index: {}]   ;;  %s1074_s2 = inlined_call_operand.vmem [shape: f32[1,128], index: 2, kind: input, shape index: {}]   ;;  %s1075_s3 = inlined_call_operand.hbm [shape: f32[2,2,128], index: 3, kind: output, shape index: {}]  }
   0x1   :  { %10 = vsyncpa [#allocation3 + $0x1], 0 }
   0x2   :  { %11 = vsyncpa [#allocation6], 0 }
   0x3   :  { %12 = vsyncpa [#allocation4], 0 }
   0x4   :  { %14 = vsyncpa [#allocation4 + $0x1], 0  ;;  %s865_s12 = smov 0   ;;  %s867_s13 = smov 0  }
   0x5   :  { %s869_s14 = smov 0   ;;  %s871_s15 = smov 0  }
   0x6 LB: > { %s886_s16 = sadd.s32 4294967295, %s836_s15   ;;  %s580_s17 = sadd.s32 4294967294, %s836_s15   ;;  %s836_s15 = sphi %s871_s15, %s1097_s15   ;;  %s832_s14 = sphi %s869_s14, %s1096_s14   ;;  %s828_s13 = sphi %s867_s13, %s1095_s13   ;;  %s824_s12 = sphi %s865_s12, %s1094_s12  }
   0x7   : > { %p40_p0 = scmp.ne.s32.totalorder %s828_s13, %s824_s12  ;;  %p1076_p1 = scmp.eq.s32.totalorder %s886_s16, 0 }
   0x8   : > { %p112_p3 = scmp.eq.s32.totalorder %s580_s17, 1  ;;  %p581_p5 = scmp.ge.s32.totalorder %s836_s15, 1 }
   0x9   : > { %p895_p4 = por %p1076_p1, %p40_p0  ;;  %p119_p7 = scmp.lt.s32.totalorder %s836_s15, 3 }
   0xa   : > { %p900_p6 = por %p112_p3, %p40_p0  ;;  %s838_s21 = smov [#allocation5]  }
   0xb   : > { %s1080_s18 = scalar_select %p895_p4, 1, 0 }
   0xc   : > { %s1081_s19 = scalar_select %p900_p6, 1, 0 }
   0xd   : > { %p905_p8 = pnand %p581_p5, %p119_p7  ;;  %s131_s22 = sshll.u32 %s838_s21, 4  ;;  %s132_s22 = int_to_ptr.vmem [resolvable:$true] %s131_s22 }
   0xe   : > { %s919_s24 = sadd.s32 1, %s836_s15   ;;  %s27_s25 = sadd.s32 1, %s832_s14 }
   0xf   : > { %s1082_s20 = scalar_select %p905_p8, 1, 0 }
  0x10   : > { %p645_p9 = pneg %p905_p8  ;;  %s24_s26 = ssub.s32 %s836_s15, %s919_s24 }
  0x11   : > { %s725_s27 = scalar_lea.vmem %s132_s22, 2048  ;;  %p733_p5 = scmp.lt.s32.totalorder %s132_s22, %s132_s22 }
  0x12   : > { %p914_p11 = pnand %p645_p9, %p1076_p1  ;;  %p726_p13 = scmp.ne.s32.totalorder %s132_s22, %s725_s27 }
  0x13   : > { %p734_p7 = scmp.lt.s32.totalorder %s725_s27, %s725_s27 }
  0x14   : > { %p716_p12 = pneg %p914_p11 }
  0x15   : > { %p735_p10 = por %p734_p7, %p733_p5 }
  0x16   : > { %p728_p0 = pnand %p726_p13, %p716_p12 }
  0x18   : > { %p729_p3 = pneg %p728_p0 }
  0x1a   : > { %p736_p2 = pnand %p735_p10, %p729_p3 }
  0x1c   : > { %739 = shalt.err (!%p736_p2)
}
  0x1d   : > { %s839_s28 = smov 64   ;;  %s840_s29 = smov 4  }
  0x1e   : > { %648 = dma.hbm_to_vmem [thread:$0]  (!%p914_p11), %s1073_s1, 2048, %s132_s22, [#allocation6], %s839_s28, %s839_s28, %s840_s29  }
  0x1f   : > { %p25_p9 = scmp.eq.s32.totalorder %s24_s26, 0  ;;  %p34_p12 = scmp.ne.s32.totalorder %s832_s14, %s828_s13 }
  0x20   : > { %p35_p10 = scmp.eq.s32.totalorder %s836_s15, 0  ;;  %p658_p2 = scmp.lt.s32.totalorder %s836_s15, 2 }
  0x21   : > { %s936_s5 = scalar_select %p25_p9, %s832_s14, %s27_s25  }
  0x22   : > { %p36_p13 = por %p35_p10, %p34_p12  ;;  %p1084_p0 = scmp.eq.s32.totalorder %s886_s16, 1 }
  0x23   : > { %s148_s7 = sand.u32 1, %s832_s14   ;;  %s614_s8 = sshll.u32 %s836_s15, 12 }
  0x24   : > { %p940_p3 = por %p1084_p0, %p34_p12  ;;  %s584_s9 = sshll.u32 %s148_s7, 8 }
  0x25   : > { %s949_s17 = scalar_lea.hbm %s1072_s0, %s614_s8  ;;  %s152_s21 = scalar_lea.vmem [#allocation2], %s584_s9 }
  0x26   : > { %s1085_s6 = scalar_select %p940_p3, 1, 0 }
  0x27   : > { %s160_s22 = sshll.u32 %s152_s21, 4  ;;  %p951_p11 = pnand %p658_p2, %p36_p13  ;;  %s955_s22 = int_to_ptr.vmem [resolvable:$true] %s160_s22 }
  0x28   : > { %s957_s25 = scalar_lea.sflag [#allocation3], %s148_s7  ;;  %s740_s26 = scalar_lea.hbm %s949_s17, 4096 }
  0x29   : > { %p741_p5 = scmp.ne.s32.totalorder %s949_s17, %s740_s26  ;;  %p742_p7 = pneg %p951_p11 }
  0x2a   : > { %s745_s29 = scalar_lea.hbm %s1072_s0, 8192  ;;  %p746_p10 = scmp.lt.s32.totalorder %s949_s17, %s1072_s0 }
  0x2b   : > { %p743_p9 = pnand %p742_p7, %p741_p5  ;;  %p747_p2 = scmp.lt.s32.totalorder %s745_s29, %s740_s26 }
  0x2d   : > { %p744_p12 = pneg %p743_p9  ;;  %p748_p13 = por %p747_p2, %p746_p10 }
  0x2f   : > { %p749_p0 = pnand %p748_p13, %p744_p12 }
  0x31   : > { %752 = shalt.err (!%p749_p0)
}
  0x32   : > { %s753_s7 = scalar_lea.vmem %s955_s22, 4096  ;;  %s841_s8 = smov [#allocation2]  }
  0x33   : > { %p754_p1 = scmp.ne.s32.totalorder %s955_s22, %s753_s7  ;;  %s758_s9 = sshll.u32 %s841_s8, 4  ;;  %s759_s9 = int_to_ptr.vmem [resolvable:$false] %s758_s9 }
  0x34   : > { %s760_s10 = scalar_lea.vmem %s759_s9, 8192  ;;  %p761_p9 = scmp.lt.s32.totalorder %s955_s22, %s759_s9 }
  0x35   : > { %p756_p6 = pnand %p754_p1, %p742_p7  ;;  %p762_p3 = scmp.lt.s32.totalorder %s760_s10, %s753_s7 }
  0x37   : > { %p757_p5 = pneg %p756_p6  ;;  %p763_p4 = por %p762_p3, %p761_p9 }
  0x39   : > { %p764_p8 = pnand %p763_p4, %p757_p5 }
  0x3b   : > { %767 = shalt.err (!%p764_p8)
}
  0x3c   : > { %s842_s11 = smov 256   ;;  %s843_s21 = smov 16  }
  0x3d   : > { %652 = dma.hbm_to_vmem [thread:$0]  (!%p951_p11), %s949_s17, 4096, %s955_s22, %s957_s25, %s842_s11, %s842_s11, %s843_s21  }
  0x3e   : > { %p1087_p1 = scmp.ne.s32.totalorder %s1082_s20, 0 }
  0x3f   : > { %s981_s26 = sand.u32 (!%p1087_p1), 1, %s828_s13   ;;  %p1088_p4 = scmp.ne.s32.totalorder (!%p1087_p1), %s1080_s18, 0 }
  0x40   : > { %172 = sbr.rel (%p1087_p1) target bundleno = 329 (0x149), region = 32  ;;  %s589_s27 = sshll.u32 (!%p1087_p1), %s981_s26, 8 }
  0x41   : > { %s175_s28 = scalar_lea.sflag (!%p1087_p1), [#allocation3], %s981_s26  ;;  %s985_s29 = scalar_lea.vmem (!%p1087_p1), [#allocation2], %s589_s27 }
  0x45   : > { %811 = dma.done.wait (%p1088_p4), %s175_s28, 4096  }
  0x46   : > { %813 = vsyncadd (%p1088_p4), %s175_s28, 4294963200  ;;  %p1089_p6 = scmp.eq.s32.totalorder %s886_s16, 0 }
  0x48   : > { %815 = dma.done.wait (%p1089_p6), [#allocation6], 2048   ;;  %p1090_p8 = pmov %p1089_p6 }
  0x49   : > { %v698_v0 = vld [vmem:[#allocation5 + $0x78] sm:$0xff]   ;;  %v700_v2 = vld [vmem:[#allocation5 + $0x70] sm:$0xff]   ;;  %v702_v4 = vld [vmem:[#allocation5 + $0x68] sm:$0xff]   ;;  %vm342_vm0 = vcmask 1041409   ;;  %s591_s18 = sshll.u32 %s981_s26, 1  ;;  %s610_s22 = sshll.u32 %s886_s16, 5 }
  0x4a   : > { %817 = vsyncadd (%p1090_p8), [#allocation6], 4294965248  ;;  %v699_v1 = vld [vmem:[#allocation5 + $0x38] sm:$0xff]   ;;  %615 = vmatprep.subr.bf16.mxu0 %v698_v0  ;;  %v701_v3 = vld [vmem:[#allocation5 + $0x30] sm:$0xff]   ;;  %s204_s23 = scalar_lea.vmem [#allocation7], %s591_s18  ;;  %s1035_s7 = scalar_lea.hbm %s1075_s3, %s610_s22 }
  0x4b   : > { %616 = vmatpush3.bf16.msra.mxu0 %v699_v1  ;;  %v703_v5 = vld [vmem:[#allocation5 + $0x28] sm:$0xff]   ;;  %v704_v6 = vld [vmem:[#allocation5 + $0x60] sm:$0xff]   ;;  %v706_v8 = vld [vmem:[#allocation5 + $0x58] sm:$0xff]   ;;  %s500_s25 = sshll.u32 %s204_s23, 4  ;;  %s487_s8 = scalar_lea.sflag [#allocation4], %s981_s26  ;;  %s501_s25 = int_to_ptr.vmem [resolvable:$true] %s500_s25 }
  0x4c   : > { %617 = vmatprep.subr.bf16.mxu0 %v700_v2  ;;  %v705_v7 = vld [vmem:[#allocation5 + $0x20] sm:$0xff]   ;;  %v707_v9 = vld [vmem:[#allocation5 + $0x18] sm:$0xff]   ;;  %v708_v10 = vld [vmem:[#allocation5 + $0x50] sm:$0xff]   ;;  %s768_s9 = scalar_lea.vmem %s501_s25, 32  ;;  %p1091_p11 = scmp.ne.s32.totalorder %s1085_s6, 0 }
  0x4d   : > { %v208_v11 = vld [vmem:[%s985_s29 + $0x8] sm:$0xff]  ;;  %v210_v12 = vld [vmem:[%s985_s29 + $0x18] sm:$0xff]  ;;  %v709_v17 = vld [vmem:[#allocation5 + $0x10] sm:$0xff]   ;;  %p769_p3 = scmp.ne.s32.totalorder %s501_s25, %s768_s9  ;;  %s844_s16 = smov [#allocation7]  }
  0x4e   : > { %v212_v13 = vld [vmem:[%s985_s29 + $0x28] sm:$0xff]  ;;  %v252_v14 = vadd.f32 %v210_v12, %v208_v11  ;;  %v214_v15 = vld [vmem:[%s985_s29 + $0x38] sm:$0xff]  ;;  %v207_v27 = vld [vmem:[%s985_s29] sm:$0xff]  ;;  %s772_s10 = sshll.u32 %s844_s16, 4  ;;  %s773_s10 = int_to_ptr.vmem [resolvable:$false] %s772_s10 }
  0x4f   : > { %618 = vmatpush3.bf16.msra.mxu0 %v701_v3  ;;  %v224_v16 = vld [vmem:[%s985_s29 + $0x88] sm:$0xff]  ;;  %v226_v18 = vld [vmem:[%s985_s29 + $0x98] sm:$0xff]  ;;  %v209_v28 = vld [vmem:[%s985_s29 + $0x10] sm:$0xff]  ;;  %p770_p7 = pnand %p769_p3, %p1091_p11  ;;  %s774_s11 = scalar_lea.vmem %s773_s10, 64 }
  0x50   : > { %619 = vmatprep.subr.bf16.mxu0 %v702_v4  ;;  %v228_v19 = vld [vmem:[%s985_s29 + $0xa8] sm:$0xff]  ;;  %v253_v20 = vadd.f32 %v252_v14, %v212_v13  ;;  %v278_v23 = vadd.f32 %v226_v18, %v224_v16  ;;  %v230_v25 = vld [vmem:[%s985_s29 + $0xb8] sm:$0xff]  ;;  %v712_v29 = vld [vmem:[#allocation5 + $0x40] sm:$0xff]   ;;  %v239_v33 = vadd.f32 %v209_v28, %v207_v27  ;;  %p775_p10 = scmp.lt.s32.totalorder %s501_s25, %s773_s10  ;;  %p776_p2 = scmp.lt.s32.totalorder %s774_s11, %s768_s9 }
  0x51   : > { %v710_v21 = vld [vmem:[#allocation5 + $0x48] sm:$0xff]   ;;  %v218_v30 = vld [vmem:[%s985_s29 + $0x58] sm:$0xff]  ;;  %v211_v32 = vld [vmem:[%s985_s29 + $0x20] sm:$0xff]  ;;  %p771_p12 = pneg %p770_p7 }
  0x52   : > { %v216_v22 = vld [vmem:[%s985_s29 + $0x48] sm:$0xff]  ;;  %v254_v26 = vadd.f32 %v253_v20, %v214_v15  ;;  %v279_v31 = vadd.f32 %v278_v23, %v228_v19  ;;  %v213_v37 = vld [vmem:[%s985_s29 + $0x30] sm:$0xff]  ;;  %v223_v39 = vld [vmem:[%s985_s29 + $0x80] sm:$0xff]  ;;  %v240_v42 = vadd.f32 %v239_v33, %v211_v32  ;;  %p777_p13 = por %p776_p2, %p775_p10 }
  0x53   : > { %620 = vmatpush3.bf16.msra.mxu0 %v703_v5  ;;  %v711_v24 = vld [vmem:[#allocation5 + $0x8] sm:$0xff]   ;;  %v225_v40 = vld [vmem:[%s985_s29 + $0x90] sm:$0xff]  ;;  %v227_v41 = vld [vmem:[%s985_s29 + $0xa0] sm:$0xff] }
  0x54   : > { %621 = vmatprep.subr.bf16.mxu0 %v704_v6  ;;  %v220_v34 = vld [vmem:[%s985_s29 + $0x68] sm:$0xff]  ;;  %v255_v36 = vadd.f32 %v254_v26, %v216_v22  ;;  %v280_v38 = vadd.f32 %v279_v31, %v230_v25  ;;  %v234_v43 = vld [vmem:[%s985_s29 + $0xd8] sm:$0xff]  ;;  %v215_v45 = vld [vmem:[%s985_s29 + $0x40] sm:$0xff]  ;;  %v265_v46 = vadd.f32 %v225_v40, %v223_v39  ;;  %v241_v50 = vadd.f32 %v240_v42, %v213_v37  ;;  %p778_p0 = pnand %p777_p13, %p771_p12 }
  0x55   : > { %v232_v35 = vld [vmem:[%s985_s29 + $0xc8] sm:$0xff]  ;;  %v222_v47 = vld [vmem:[%s985_s29 + $0x78] sm:$0xff]  ;;  %v229_v49 = vld [vmem:[%s985_s29 + $0xb0] sm:$0xff] }
  0x56   : > { %v256_v44 = vadd.f32 %v255_v36, %v218_v30  ;;  %v281_v48 = vadd.f32 %v280_v38, %v232_v35  ;;  %v713_v51 = vld [vmem:[#allocation5] sm:$0xff]   ;;  %v236_v52 = vld [vmem:[%s985_s29 + $0xe8] sm:$0xff]  ;;  %v217_v54 = vld [vmem:[%s985_s29 + $0x50] sm:$0xff]  ;;  %v266_v55 = vadd.f32 %v265_v46, %v227_v41  ;;  %v242_v58 = vadd.f32 %v241_v50, %v215_v45 }
  0x57   : > { %622 = vmatpush3.bf16.msra.mxu0 %v705_v7  ;;  %v231_v57 = vld [vmem:[%s985_s29 + $0xc0] sm:$0xff]  ;;  %v238_v59 = vld [vmem:[%s985_s29 + $0xf8] sm:$0xff]  ;;  %v233_v0 = vld [vmem:[%s985_s29 + $0xd0] sm:$0xff] }
  0x58   : > { %623 = vmatprep.subr.bf16.mxu0 %v706_v8  ;;  %v257_v53 = vadd.f32 %v256_v44, %v220_v34  ;;  %v282_v56 = vadd.f32 %v281_v48, %v234_v43  ;;  %v219_v61 = vld [vmem:[%s985_s29 + $0x60] sm:$0xff]  ;;  %v267_v62 = vadd.f32 %v266_v55, %v229_v49  ;;  %v243_v1 = vadd.f32 %v242_v58, %v217_v54  ;;  %v221_v3 = vld [vmem:[%s985_s29 + $0x70] sm:$0xff] }
  0x59   : > { %v235_v6 = vld [vmem:[%s985_s29 + $0xe0] sm:$0xff]  ;;  %v237_v11 = vld [vmem:[%s985_s29 + $0xf0] sm:$0xff] }
  0x5a   : > { %v258_v60 = vadd.f32 %v257_v53, %v222_v47  ;;  %v283_v63 = vadd.f32 %v282_v56, %v236_v52  ;;  %v268_v4 = vadd.f32 %v267_v62, %v231_v57  ;;  %v244_v7 = vadd.f32 %v243_v1, %v219_v61  ;;  %v592_v49 = vld [vmem:[%s1074_s2] ss:$0 sm:$0xff] }
  0x5b   : > { %624 = vmatpush3.bf16.msra.mxu0 %v707_v9 }
  0x5c   : > { %625 = vmatprep.subr.bf16.mxu0 %v708_v10  ;;  %v259_v2 = vrot.slane %v258_v60, 4  ;;  %v284_v5 = vadd.f32 %v283_v63, %v238_v59  ;;  %v269_v9 = vadd.f32 %v268_v4, %v233_v0  ;;  %v245_v12 = vadd.f32 %v244_v7, %v221_v3 }
  0x5e   : > { %v260_v8 = vadd.f32 %v259_v2, %v258_v60  ;;  %v285_v10 = vrot.slane %v284_v5, 4  ;;  %v270_v14 = vadd.f32 %v269_v9, %v235_v6  ;;  %v246_v16 = vrot.slane %v245_v12, 4 }
  0x5f   : > { %626 = vmatpush3.bf16.msra.mxu0 %v709_v17 }
  0x60   : > { %627 = vmatprep.subr.bf16.mxu0 %v710_v21  ;;  %v261_v13 = vrot.slane %v260_v8, 2  ;;  %v286_v15 = vadd.f32 %v285_v10, %v284_v5  ;;  %v271_v18 = vadd.f32 %v270_v14, %v237_v11  ;;  %v247_v20 = vadd.f32 %v246_v16, %v245_v12 }
  0x62   : > { %v262_v17 = vadd.f32 %v261_v13, %v260_v8  ;;  %v287_v19 = vrot.slane %v286_v15, 2  ;;  %v272_v22 = vrot.slane %v271_v18, 4 }
  0x63   : > { %628 = vmatpush3.bf16.msra.mxu0 %v711_v24  ;;  %v248_v24 = vrot.slane %v247_v20, 2 }
  0x64   : > { %629 = vmatprep.subr.bf16.mxu0 %v712_v29  ;;  %v263_v21 = vrot.slane %v262_v17, 1  ;;  %v288_v23 = vadd.f32 %v287_v19, %v286_v15  ;;  %v273_v26 = vadd.f32 %v272_v22, %v271_v18 }
  0x65   : > { %v249_v28 = vadd.f32 %v248_v24, %v247_v20 }
  0x66   : > { %v264_v25 = vadd.f32 %v263_v21, %v262_v17  ;;  %v289_v27 = vrot.slane %v288_v23, 1  ;;  %v274_v30 = vrot.slane %v273_v26, 2 }
  0x67   : > { %630 = vmatpush3.bf16.msra.mxu0 %v713_v51  ;;  %v250_v32 = vrot.slane %v249_v28, 1 }
  0x68   : > { %v292_v29 = vpack.c.bf16 %v264_v25, %v264_v25  ;;  %v290_v31 = vadd.f32 %v289_v27, %v288_v23  ;;  %v275_v33 = vadd.f32 %v274_v30, %v273_v26 }
  0x69   : > { %v251_v36 = vadd.f32 %v250_v32, %v249_v28 }
  0x6a   : > { %v294_v34 = vpack.c.bf16 %v290_v31, %v290_v31  ;;  %v339_v35 = vunpack.c.l.b16 %v292_v29  ;;  %v276_v37 = vrot.slane %v275_v33, 1 }
  0x6b   : > { %v291_v39 = vpack.c.bf16 %v251_v36, %v251_v36 }
  0x6c   : > { %v341_v38 = vunpack.c.l.b16 %v294_v34  ;;  %v277_v40 = vadd.f32 %v276_v37, %v275_v33 }
  0x6d   : > { %v338_v44 = vunpack.c.l.b16 %v291_v39 }
  0x6e   : > { %v344_v41 = vsel %vm342_vm0, %v341_v38, %v339_v35  ;;  %v293_v43 = vpack.c.bf16 %v277_v40, %v277_v40 }
  0x6f   : > { %v346_v42 = vpack.c.b16 %v344_v41, %v344_v41 }
  0x70   : > { %v340_v45 = vunpack.c.l.b16 %v293_v43 }
  0x71   : > { %477 = vmatprep.mubr.bf16.mxu0 %v346_v42 }
  0x72   : > { %v343_v46 = vsel %vm342_vm0, %v340_v45, %v338_v44 }
  0x73   : > { %v345_v47 = vpack.c.b16 %v343_v46, %v343_v46 }
  0x75   : > { %478 = vmatmul.mubr.bf16.vlgmr.msra.gmra.mxu0 %v345_v47 }
 0x135   : > { %v631_v48 = vpop.f32.mrf.mxu0 }
 0x137   : > { %v632_v50 = vpop.f32.mrf.mxu0 }
 0x138   : > { %v633_v51 = vadd.f32 %v632_v50, %v631_v48 }
 0x139   : > { %v634_v52 = vpop.f32.mrf.mxu0 }
 0x13a   : > { %v480_v53 = vadd.f32 %v633_v51, %v592_v49 }
 0x13b   : > { %v635_v54 = vpop.f32.mrf.mxu0 }
 0x13c   : > { %485 = vst [vmem:[%s204_s23] sm:$0x3] %v480_v53 }
 0x13d   : > { %781 = shalt.err (!%p778_p0)
}
 0x13e   : > { %s782_s21 = scalar_lea.hbm %s1035_s7, 32  ;;  %s786_s28 = scalar_lea.hbm %s1075_s3, 64 }
 0x13f   : > { %p783_p5 = scmp.ne.s32.totalorder %s1035_s7, %s782_s21  ;;  %p787_p4 = scmp.lt.s32.totalorder %s1035_s7, %s1075_s3 }
 0x140   : > { %p788_p6 = scmp.lt.s32.totalorder %s786_s28, %s782_s21 }
 0x141   : > { %p784_p9 = pnand %p783_p5, %p1091_p11 }
 0x142   : > { %p789_p8 = por %p788_p6, %p787_p4 }
 0x143   : > { %p785_p1 = pneg %p784_p9 }
 0x145   : > { %p790_p3 = pnand %p789_p8, %p785_p1 }
 0x147   : > { %793 = shalt.err (!%p790_p3)
}
 0x148   : > { %643 = dma.vmem_to_hbm [thread:$0]  (%p1091_p11), %s501_s25, 32, %s1035_s7, %s487_s8  }
 0x149 PF: > { %s512_s20 = sand.u32 1, %s824_s12   ;;  %p1092_p7 = scmp.ne.s32.totalorder %s1081_s19, 0 }
 0x14a   : > { %p1093_p12 = scmp.ge.s32.totalorder %s836_s15, 2  ;;  %s513_s17 = scalar_lea.sflag [#allocation4], %s512_s20 }
 0x14c   : > { %p654_p10 = pnand %p1093_p12, %p1092_p7 }
 0x14e   : > { %p655_p2 = pneg %p654_p10 }
 0x150   : > { %819 = dma.done.wait (%p655_p2), %s513_s17, 32  }
 0x151   : > { %821 = vsyncadd (%p655_p2), %s513_s17, 4294967264  ;;  %p17_p13 = scmp.ge.s32.totalorder %s919_s24, 4   ;;  %s1094_s12 = smov %s828_s13 }
 0x152   : > { %s1095_s13 = smov %s832_s14  ;;  %s1096_s14 = smov %s936_s5 }
 0x153   : > { %s1097_s15 = smov %s919_s24  ;;  %19 = sbr.rel (!%p17_p13) target bundleno = 6 (0x6), region = 81 }
 0x158   :  { %518 = vsyncpa [#allocation3], 1 }
 0x159   :  { %520 = vsyncpa [#allocation3 + $0x1], 1 }
 0x15a   :  { %521 = vsyncpa [#allocation6], 1 }
 0x15b   :  { %522 = vsyncpa [#allocation4], 1 }
 0x15c   :  { %524 = vsyncpa [#allocation4 + $0x1], 1 }

</bundles_post_ra>
